<compile_context>
chip_gen: v7x
topology: tpu7x:2x2x1
jax: 0.10.0
libtpu: 0.0.40
codegen_flags: <defaults>
</compile_context>

<pallas_src>
import functools

import jax
import jax.numpy as jnp
from jax import lax
from jax.experimental import pallas as pl
from jax.experimental.pallas import tpu as pltpu

K_IN = 100                         # input features of linear1
DEFAULT_TB = 32768                 # 32768 * 100 * 4 B ~= 12.5 MiB per x tile
VMEM_LIMIT_BYTES = 48 * 1024 * 1024


def _round_up(n, m):
    return ((n + m - 1) // m) * m


def _fused_kernel(x_ref, wc_ref, z_ref, colsum_ref, *, total_rows, tile_rows):
    """One batch tile of the folded model.

    x_ref:      (tb, 100)     input rows, streamed per grid step (ragged last tile)
    wc_ref:     (100, 1)      folded output weight W1 @ W2 (VMEM-resident)
    z_ref:      (tb, 1)       raw pre-activation x @ wc (bias + sigmoid in wrapper)
    colsum_ref: (1, 1, 100)   per-tile column sum of x (MOCK partial, lane-dense)
    """
    x = x_ref[...]

    # Single MXU matmul per tile; rows past `total_rows` in the last ragged tile
    # produce garbage z rows, but the pipeline drops writes beyond the (B, 1)
    # output array, so no masking is needed here.
    z_ref[...] = jnp.dot(x, wc_ref[...], preferred_element_type=jnp.float32)

    # Column sum for MOCK.  Only mask when the grid is ragged (static decision);
    # the select + sublane-reduce is pure VALU work hidden under the tile DMA.
    if total_rows % tile_rows != 0:
        valid = total_rows - pl.program_id(0) * tile_rows
        rows = lax.broadcasted_iota(jnp.int32, x.shape, 0)
        x = jnp.where(rows < valid, x, 0.0)
    colsum = jnp.sum(x, axis=0, keepdims=True)            # (1, 100)
    colsum_ref[...] = colsum.reshape(1, 1, x.shape[1])    # lane-dense block


def better_signature_forward(x, w1, b1, w2, b2, *, tb=DEFAULT_TB):
    """x: (B, 100) f32.  w1: (100, 25), b1: (1, 25), w2: (25, 1), b2: (1, 1)
    (weights stored pre-transposed as (in_features, out_features)).

    Returns (out (B, 1) f32, mock scalar f32) matching the PyTorch module:
      out  = sigmoid(linear2(linear1(x)))
      mock = sum(linear1(x))
    """
    B, k = x.shape
    assert k == K_IN
    hp = lax.Precision.HIGHEST

    # --- Fold the two linear layers (exact up to fp reassociation). ------------
    wc = jnp.dot(w1, w2, precision=hp)                        # (100, 1)
    w1s = jnp.sum(w1, axis=1)                                 # (100,)
    bc = (jnp.dot(b1, w2, precision=hp) + b2).reshape(())     # scalar folded bias

    x = x.astype(jnp.float32)
    tb = max(8, min(tb, _round_up(B, 8)))     # tile rows (multiple of 8 sublanes)
    num_tiles = pl.cdiv(B, tb)                # ragged grid: no batch padding/copy

    kernel = functools.partial(_fused_kernel, total_rows=B, tile_rows=tb)

    z, colsums = pl.pallas_call(
        kernel,
        out_shape=(
            jax.ShapeDtypeStruct((B, 1), jnp.float32),            # raw z column
            jax.ShapeDtypeStruct((num_tiles, 1, K_IN), jnp.float32),  # MOCK partials
        ),
        grid=(num_tiles,),
        in_specs=[
            # Streamed, double-buffered x tiles (no HBM-side pad copy).
            pl.BlockSpec((tb, K_IN), lambda i: (i, 0)),
            # Tiny folded weight, constant index_map -> stays resident in VMEM.
            pl.BlockSpec((K_IN, 1), lambda i: (0, 0)),
        ],
        out_specs=(
            pl.BlockSpec((tb, 1), lambda i: (i, 0)),
            pl.BlockSpec((1, 1, K_IN), lambda i: (i, 0, 0)),
        ),
        compiler_params=pltpu.CompilerParams(
            dimension_semantics=("parallel",),       # independent batch tiles
            vmem_limit_bytes=VMEM_LIMIT_BYTES,       # big tiles, all generations
        ),
        cost_estimate=pl.CostEstimate(
            flops=4 * B * K_IN,
            transcendentals=0,
            bytes_accessed=B * K_IN * 4 + B * 4 + num_tiles * K_IN * 4,
        ),
    )(x, wc)

    # Lane-dense wrapper epilogue: bias + sigmoid over the flat (B,) vector.
    out = jax.nn.sigmoid(z.reshape(B) + bc).reshape(B, 1)

    # sum(hidden) = colsum(x) @ W1.sum(axis=1) + B * sum(b1)
    mock = jnp.dot(jnp.sum(colsums, axis=(0, 1)), w1s, precision=hp) + B * jnp.sum(b1)
    return out, mock


def init_params(key):
    """Deterministic parameter init matching nn.Linear shapes.

    linear1: weight (25, 100), bias (25,)  -> stored transposed as (100, 25)
    linear2: weight (1, 25),   bias (1,)   -> stored transposed as (25, 1)
    """
    k1, k2, k3, k4 = jax.random.split(key, 4)
    bound1 = 1.0 / jnp.sqrt(100.0)
    bound2 = 1.0 / jnp.sqrt(25.0)
    w1 = jax.random.uniform(k1, (100, 25), jnp.float32, -bound1, bound1)
    b1 = jax.random.uniform(k2, (1, 25), jnp.float32, -bound1, bound1)
    w2 = jax.random.uniform(k3, (25, 1), jnp.float32, -bound2, bound2)
    b2 = jax.random.uniform(k4, (1, 1), jnp.float32, -bound2, bound2)
    return w1, b1, w2, b2


if __name__ == "__main__":
    key = jax.random.PRNGKey(0)
    kx, kp, kx2 = jax.random.split(key, 3)

    w1, b1, w2, b2 = init_params(kp)
    hp = lax.Precision.HIGHEST

    def reference(x):
        h = jnp.dot(x, w1, precision=hp) + b1
        o = jax.nn.sigmoid(jnp.dot(h, w2, precision=hp) + b2)
        return o, jnp.sum(h)

    # --- Small batch: single grid tile. ----------------------------------------
    x_small = jax.random.normal(kx, (16, K_IN), jnp.float32)
    out, mock = better_signature_forward(x_small, w1, b1, w2, b2)
    jax.block_until_ready((out, mock))
    ref_out, ref_mock = reference(x_small)
    assert out.shape == (16, 1)
    assert jnp.allclose(out, ref_out, atol=1e-5, rtol=1e-5)
    assert jnp.allclose(mock, ref_mock, atol=1e-3, rtol=1e-4)

    # --- Larger, non-multiple batch: exercises the ragged grid + in-kernel mask. -
    x_big = jax.random.normal(kx2, (1000, K_IN), jnp.float32)
    out_b, mock_b = better_signature_forward(x_big, w1, b1, w2, b2, tb=256)
    jax.block_until_ready((out_b, mock_b))
    ref_out_b, ref_mock_b = reference(x_big)
    assert out_b.shape == (1000, 1)
    assert jnp.allclose(out_b, ref_out_b, atol=1e-5, rtol=1e-5)
    # Tolerance covers fp32 summation-order differences over 25k terms.
    assert jnp.allclose(mock_b, ref_mock_b, atol=5e-2, rtol=1e-4)

    print("KERNEL_OK")
</pallas_src>

<mosaic_0001>
module attributes {stable_mosaic.version = 11 : i64} {
  func.func @_fused_kernel(%arg0: i32, %arg1: memref<16x100xf32, #tpu.memory_space<vmem>>, %arg2: memref<100x1xf32, #tpu.memory_space<vmem>>, %arg3: memref<16x1xf32, #tpu.memory_space<vmem>>, %arg4: memref<1x1x100xf32, #tpu.memory_space<vmem>>) attributes {dimension_semantics = [#tpu.dimension_semantics<parallel>], iteration_bounds = array<i64: 1>, scalar_prefetch = 0 : i64, scratch_operands = 0 : i64, tpu.core_type = #tpu.core_type<tc>, window_params = [{transform_indices = @transform_0, window_bounds = array<i64: 16, 100>}, {pipeline_mode = #tpu.pipeline_mode<synchronous>, transform_indices = @transform_1, window_bounds = array<i64: 100, 1>}, {transform_indices = @transform_2, window_bounds = array<i64: 16, 1>}, {transform_indices = @transform_3, window_bounds = array<i64: 1, 1, 100>}]} {
    %c0 = arith.constant 0 : index
    %c0_0 = arith.constant 0 : index
    %0 = vector.load %arg1[%c0, %c0_0] : memref<16x100xf32, #tpu.memory_space<vmem>>, vector<16x100xf32>
    %c0_1 = arith.constant 0 : index
    %c0_2 = arith.constant 0 : index
    %1 = vector.load %arg2[%c0_1, %c0_2] : memref<100x1xf32, #tpu.memory_space<vmem>>, vector<100x1xf32>
    %cst = arith.constant dense<0.000000e+00> : vector<16x1xf32>
    %2 = tpu.matmul %0, %1, %cst {dimension_numbers = #tpu.dot_dimension_numbers<[1], [0], [0], [1], [0, 0, 1, 1], [], []>} : vector<16x100xf32>, vector<100x1xf32>, vector<16x1xf32> -> vector<16x1xf32>
    %c0_3 = arith.constant 0 : index
    %c0_4 = arith.constant 0 : index
    %3 = vector.load %arg3[%c0_3, %c0_4] : memref<16x1xf32, #tpu.memory_space<vmem>>, vector<16x1xf32>
    tpu.vector_store %arg3[%c0_3, %c0_4], %2 {strides = array<i32>} : memref<16x1xf32, #tpu.memory_space<vmem>>, vector<16x1xf32>,
    %cst_5 = arith.constant dense<0.000000e+00> : vector<100xf32>
    %4 = vector.multi_reduction <add>, %0, %cst_5 [0] : vector<16x100xf32> to vector<100xf32>
    %5 = vector.shape_cast %4 : vector<100xf32> to vector<1x100xf32>
    %6 = vector.shape_cast %5 : vector<1x100xf32> to vector<1x1x100xf32>
    %c0_6 = arith.constant 0 : index
    %c0_7 = arith.constant 0 : index
    %c0_8 = arith.constant 0 : index
    %7 = vector.load %arg4[%c0_6, %c0_7, %c0_8] : memref<1x1x100xf32, #tpu.memory_space<vmem>>, vector<1x1x100xf32>
    tpu.vector_store %arg4[%c0_6, %c0_7, %c0_8], %6 {strides = array<i32>} : memref<1x1x100xf32, #tpu.memory_space<vmem>>, vector<1x1x100xf32>,
    return
  }
  func.func @transform_0(%arg0: i32) -> (i32, i32) {
    %c0_i32 = arith.constant 0 : i32
    %c0_i32_0 = arith.constant 0 : i32
    return %arg0, %c0_i32 : i32, i32
  }
  func.func @transform_1(%arg0: i32) -> (i32, i32) {
    %c0_i32 = arith.constant 0 : i32
    %c0_i32_0 = arith.constant 0 : i32
    %c0_i32_1 = arith.constant 0 : i32
    return %c0_i32, %c0_i32_0 : i32, i32
  }
  func.func @transform_2(%arg0: i32) -> (i32, i32) {
    %c0_i32 = arith.constant 0 : i32
    %c0_i32_0 = arith.constant 0 : i32
    return %arg0, %c0_i32 : i32, i32
  }
  func.func @transform_3(%arg0: i32) -> (i32, i32, i32) {
    %c0_i32 = arith.constant 0 : i32
    %c0_i32_0 = arith.constant 0 : i32
    %c0_i32_1 = arith.constant 0 : i32
    return %arg0, %c0_i32, %c0_i32_0 : i32, i32, i32
  }
}

</mosaic_0001>

<bundles_post_ra>
// kernel: tpu_custom_call.1
= control target key start
LH: loop header
LB: loop body
LE: loop exit
PB: predicated region body
PF: predicated region fallthrough
CT: control target
= control target key end

     0   :  { %vm29_vm0 = vcmask 818176   ;;  %s331_s0 = inlined_call_operand.vmem [shape: f32[16,100], index: 0, kind: input, shape index: {}]   ;;  %s332_s1 = inlined_call_operand.vmem [shape: f32[100,1], index: 1, kind: input, shape index: {}]   ;;  %s333_s2 = inlined_call_operand.vmem [shape: f32[16,1], index: 2, kind: output, shape index: {0}]   ;;  %s334_s3 = inlined_call_operand.hbm [shape: f32[1,1,100], index: 3, kind: output, shape index: {1}]  }
   0x1   :  { %v16_v0 = vld [vmem:[%s332_s1] sm:$0xff]  ;;  %v17_v1 = vld [vmem:[%s332_s1 + $0x8] sm:$0xff]  ;;  %v18_v2 = vld [vmem:[%s332_s1 + $0x10] sm:$0xff] }
   0x2   :  { %v194_v3 = vpack.c.bf16 %v17_v1, %v16_v0  ;;  %v19_v4 = vld [vmem:[%s332_s1 + $0x18] sm:$0xff]  ;;  %v20_v6 = vld [vmem:[%s332_s1 + $0x20] sm:$0xff]  ;;  %v21_v7 = vld [vmem:[%s332_s1 + $0x28] sm:$0xff] }
   0x3   :  { %v198_v5 = vpack.c.bf16 %v19_v4, %v18_v2  ;;  %v14_v8 = vld [vmem:[%s331_s0] sm:$0xff]  ;;  %v15_v9 = vld [vmem:[%s331_s0 + $0x8] sm:$0xff]  ;;  %v202_v10 = vpack.c.bf16 %v21_v7, %v20_v6 }
   0x4   :  { %195 = vmatprep.subr.bf16.mxu0 %v194_v3  ;;  %191 = vmatprep.mubr.msk.f32.mxu0 %vm29_vm0, %v14_v8  ;;  %v118_v11 = vsel %vm29_vm0, %v14_v8, 0.0  ;;  %v119_v12 = vsel %vm29_vm0, %v15_v9, 0.0 }
   0x5   :  { %197 = vmatpush3.bf16.msra.mxu0 %v194_v3 }
   0x6   :  { %199 = vmatprep.subr.bf16.mxu0 %v198_v5 }
   0x7   :  { %9 = vsyncpa [#allocation3], 0  ;;  %v22_v13 = vld [vmem:[%s332_s1 + $0x30] sm:$0xff]  ;;  %v23_v14 = vld [vmem:[%s332_s1 + $0x38] sm:$0xff]  ;;  %v120_v15 = vadd.f32 %v119_v12, %v118_v11  ;;  %vm36_vm1 = vcmask 1043456   ;;  %vm127_vm2 = vcmask 811008  }
   0x8   :  { %v206_v16 = vpack.c.bf16 %v23_v14, %v22_v13  ;;  %v24_v17 = vld [vmem:[%s332_s1 + $0x40] sm:$0xff]  ;;  %v25_v18 = vld [vmem:[%s332_s1 + $0x48] sm:$0xff]  ;;  %v26_v20 = vld [vmem:[%s332_s1 + $0x50] sm:$0xff]  ;;  %s243_s14 = smov [#allocation2]  }
   0x9   :  { %201 = vmatpush3.bf16.msra.mxu0 %v198_v5  ;;  %v210_v19 = vpack.c.bf16 %v25_v18, %v24_v17  ;;  %v27_v21 = vld [vmem:[%s332_s1 + $0x58] sm:$0xff]  ;;  %v28_v23 = vld [vmem:[%s332_s1 + $0x60] sm:$0xf]  ;;  %v121_v24 = vrot.slane %v120_v15, 4  ;;  %s137_s15 = sshll.u32 %s243_s14, 4  ;;  %s138_s15 = int_to_ptr.vmem [resolvable:$true] %s137_s15 }
   0xa   :  { %203 = vmatprep.subr.bf16.mxu0 %v202_v10  ;;  %v214_v22 = vpack.c.bf16 %v27_v21, %v26_v20  ;;  %s219_s16 = scalar_lea.vmem %s138_s15, 16  ;;  %s223_s1 = scalar_lea.vmem %s138_s15, 32 }
   0xb   :  { %v122_v25 = vadd.f32 %v121_v24, %v120_v15  ;;  %p220_p0 = scmp.ne.s32.totalorder %s138_s15, %s219_s16  ;;  %p224_p1 = scmp.lt.s32.totalorder %s138_s15, %s138_s15 }
   0xc   :  { %p225_p2 = scmp.lt.s32.totalorder %s223_s1, %s219_s16 }
   0xd   :  { %205 = vmatpush3.bf16.msra.mxu0 %v202_v10  ;;  %v123_v26 = vrot.slane %v122_v25, 2 }
   0xe   :  { %207 = vmatprep.subr.bf16.mxu0 %v206_v16  ;;  %p226_p3 = por %p225_p2, %p224_p1 }
   0xf   :  { %v124_v27 = vadd.f32 %v123_v26, %v122_v25 }
  0x10   :  { %p227_p4 = pnand %p226_p3, %p220_p0 }
  0x11   :  { %209 = vmatpush3.bf16.msra.mxu0 %v206_v16  ;;  %v125_v28 = vrot.slane %v124_v27, 1 }
  0x12   :  { %211 = vmatprep.subr.bf16.mxu0 %v210_v19 }
  0x13   :  { %v126_v29 = vadd.f32 %v125_v28, %v124_v27 }
  0x15   :  { %213 = vmatpush3.bf16.msra.mxu0 %v210_v19  ;;  %128 = vst.msk [vmem:[#allocation2] sm:$0x1] %vm127_vm2, %v126_v29 }
  0x16   :  { %215 = vmatprep.subr.bf16.mxu0 %v214_v22 }
  0x19   :  { %217 = vmatpush3.bf16.msra.mxu0 %v214_v22 }
  0x1a   :  { %189 = vmatprep.subr.msk.mxu0 %vm36_vm1, %v28_v23 }
  0x1d   :  { %190 = vmatpush3.msk.msra.mxu0 %vm36_vm1, %v28_v23 }
  0x1e   :  { %192 = vmatmul.mubr.msk.f32.vlgmr.msra.gmra.mrb[0].mxu0 %vm29_vm0, %v15_v9 }
  0x1f   :  { %230 = shalt.err (!%p227_p4)
}
  0x20   :  { %s231_s19 = scalar_lea.hbm %s334_s3, 16 }
  0x21   :  { %p232_p5 = scmp.ne.s32.totalorder %s334_s3, %s231_s19  ;;  %p235_p6 = scmp.lt.u32.totalorder %s231_s19, %s334_s3 }
  0x23   :  { %p237_p7 = pnand %p235_p6, %p232_p5 }
  0x25   :  { %240 = shalt.err (!%p237_p7)
}
  0x26   :  { %140 = dma.vmem_to_hbm [thread:$0]  %s138_s15, 16, %s334_s3, [#allocation3]   ;;  %vm115_vm3 = vcmask 7168  }
  0xf1   :  { %v193_v30 = vpop.f32.mrb[0].mxu0 }
  0xf2   :  { %117 = vst.msk [vmem:[%s333_s2 + $0x8] sm:$0xff] %vm115_vm3, %v193_v30  ;;  %v106_v31 = vpop.f32.mrb[1].mxu0 }
  0xf3   :  { %116 = vst.msk [vmem:[%s333_s2] sm:$0xff] %vm115_vm3, %v106_v31 }
  0xf4   :  { %241 = dma.done.wait [#allocation3], 16  }
  0xf5   :  { %242 = vsyncadd [#allocation3], 4294967280 }
  0xf6   :  { %146 = vsyncpa [#allocation3], 1 }

</bundles_post_ra>
